<compile_context>
chip_gen: v5e
topology: v5e:2x2
jax: 0.10.0
libtpu: 0.0.40
codegen_flags: <defaults>
</compile_context>

<pallas_src>
import functools

import jax
import jax.numpy as jnp
from jax.experimental import pallas as pl
from jax.experimental.pallas import tpu as pltpu


def _round_up(n, m):
    return ((n + m - 1) // m) * m


def _pick_batch_tile(B, D, requested):
    """Choose the batch tile.

    - keep the double-buffered x + output streams under a conservative VMEM budget,
    - aim for >= ~8 grid steps so the parallel batch axis shards across both v7x
      TensorCores with enough steps each for the pipeline to fill,
    - round to 16 rows (bf16 packs 16 sublanes per vreg).
    """
    row_bytes = 2 * (D * 4 + 64 * 4 + 4)          # 2x-buffered f32 x + f32 outputs
    vmem_rows = max(16, (16 * 1024 * 1024) // row_bytes)
    steps_rows = max(16, pl.cdiv(B, 8))
    bt = max(8, min(requested, vmem_rows, steps_rows, B))
    return _round_up(bt, 16 if bt >= 16 else 8)


def _disc_kernel(x_ref, w1_ref, w2_ref, sp_ref, feat_ref, val_ref, *scratch,
                 h2_dim, d_pad, neg_slope, compute_dtype):
    # x_ref:   [bt, D]    input rows, native dtype (no wrapper pad/cast copy)
    # w1_ref:  [Dp, 128]  first-layer weight, K zero-padded to a lane multiple
    # w2_ref:  [128, 64]
    # sp_ref:  [8, 128] f32 packed small params:
    #            row 0 = b1, row 1[:64] = b2, row 2[0] = b3, row 3[:64] = w3 (as a row)
    # feat_ref:[bt, 64] f32   features output
    # val_ref: [bt, 1]  f32   sigmoid(logit) output
    # scratch (only when d_pad > 0): [bt, Dp] compute_dtype zero-fill buffer for K tail.
    x = x_ref[...].astype(compute_dtype)
    if d_pad:
        # Zero-fill the K tail in VMEM (much cheaper than padding x in HBM).
        xp_ref = scratch[0]
        xp_ref[...] = jnp.zeros_like(xp_ref)
        xp_ref[:, : x.shape[1]] = x
        x = xp_ref[...]

    w1 = w1_ref[...]
    w2 = w2_ref[...]
    b1 = sp_ref[0:1, :]                     # [1, 128]
    b2 = sp_ref[1:2, 0:h2_dim]              # [1, 64]
    b3 = sp_ref[2:3, 0:1]                   # [1, 1]
    w3_row = sp_ref[3:4, 0:h2_dim]          # [1, 64]

    # Linear(D,128) + LeakyReLU(0.2)   (MXU, f32 accumulation)
    h1 = jnp.dot(x, w1, preferred_element_type=jnp.float32) + b1
    h1 = jnp.where(h1 > 0, h1, neg_slope * h1)

    # Linear(128,64) + LeakyReLU(0.2)
    h2 = jnp.dot(h1.astype(w2.dtype), w2, preferred_element_type=jnp.float32) + b2
    h2 = jnp.where(h2 > 0, h2, neg_slope * h2)          # features, f32 [bt, 64]

    # Linear(64,1) + sigmoid: VPU multiply + XLU lane reduce (avoid an N=1 MXU matmul).
    logit = jnp.sum(h2 * w3_row, axis=-1, keepdims=True) + b3   # [bt, 1]
    validity = jax.nn.sigmoid(logit)                            # [bt, 1]

    # Two direct stores (no lane-concatenate, no redundant broadcast lanes).
    feat_ref[...] = h2.astype(feat_ref.dtype)
    val_ref[...] = validity.astype(val_ref.dtype)


@functools.partial(jax.jit, static_argnames=("batch_tile", "compute_dtype"))
def discriminator_forward(x, params, *, batch_tile=1024, compute_dtype=jnp.bfloat16):
    """Discriminator forward. Returns (validity [B,1] f32, features [B,64] f32).

    Note: the default compute_dtype=bfloat16 runs the two matmuls with bf16 operands
    and f32 accumulation; pass compute_dtype=jnp.float32 for f32-faithful numerics.
    """
    w1, b1, w2, b2, w3, b3 = params
    B, D = x.shape
    H1, H2 = w1.shape[1], w2.shape[1]
    assert H1 == 128 and H2 == 64, "module fixes the hidden sizes to 128 / 64"

    Dp = _round_up(D, 128)                  # lane-aligned K for x @ w1
    d_pad = Dp - D
    bt = _pick_batch_tile(B, D, batch_tile)
    grid = (pl.cdiv(B, bt),)                # partial last block handled by Pallas masks

    # Weights are tiny: cast / K-pad them in the wrapper (one-time, fused by XLA).
    if d_pad:
        w1_p = jnp.zeros((Dp, H1), compute_dtype).at[:D, :].set(w1.astype(compute_dtype))
    else:
        w1_p = w1.astype(compute_dtype)
    w2_c = w2.astype(compute_dtype)

    # Pack the tiny params into one (8, 128) f32 slab (one grid-constant input stream).
    sp = jnp.zeros((8, H1), jnp.float32)
    sp = sp.at[0, :H1].set(b1.reshape(H1))
    sp = sp.at[1, :H2].set(b2.reshape(H2))
    sp = sp.at[2, 0].set(b3.reshape(()))
    sp = sp.at[3, :H2].set(w3.reshape(H2))

    scratch_shapes = [pltpu.VMEM((bt, Dp), compute_dtype)] if d_pad else []

    kernel = functools.partial(_disc_kernel, h2_dim=H2, d_pad=d_pad,
                               neg_slope=0.2, compute_dtype=compute_dtype)

    features, validity = pl.pallas_call(
        kernel,
        out_shape=(
            jax.ShapeDtypeStruct((B, H2), jnp.float32),   # features
            jax.ShapeDtypeStruct((B, 1), jnp.float32),    # validity
        ),
        grid_spec=pltpu.PrefetchScalarGridSpec(
            num_scalar_prefetch=0,
            grid=grid,
            in_specs=[
                pl.BlockSpec((bt, D), lambda i: (i, 0)),    # x tile (pipelined, f32)
                pl.BlockSpec((Dp, H1), lambda i: (0, 0)),   # w1 (grid-constant block)
                pl.BlockSpec((H1, H2), lambda i: (0, 0)),   # w2 (grid-constant block)
                pl.BlockSpec((8, H1), lambda i: (0, 0)),    # packed b1/b2/b3/w3
            ],
            out_specs=[
                pl.BlockSpec((bt, H2), lambda i: (i, 0)),   # features [B,64] f32
                pl.BlockSpec((bt, 1), lambda i: (i, 0)),    # validity [B,1]  f32
            ],
            scratch_shapes=scratch_shapes,
        ),
        compiler_params=pltpu.CompilerParams(
            dimension_semantics=("parallel",),
            vmem_limit_bytes=48 * 1024 * 1024,
        ),
    )(x, w1_p, w2_c, sp)

    return validity, features


def init_params(key, input_dim):
    """Deterministic init mimicking PyTorch nn.Linear default (U[-1/sqrt(fan_in), +])."""
    def linear(key, fan_in, fan_out):
        kw, kb = jax.random.split(key)
        bound = 1.0 / jnp.sqrt(fan_in)
        w = jax.random.uniform(kw, (fan_in, fan_out), jnp.float32, -bound, bound)
        b = jax.random.uniform(kb, (1, fan_out), jnp.float32, -bound, bound)
        return w, b

    k1, k2, k3 = jax.random.split(key, 3)
    w1, b1 = linear(k1, input_dim, 128)
    w2, b2 = linear(k2, 128, 64)
    w3, b3 = linear(k3, 64, 1)
    return (w1, b1, w2, b2, w3, b3)


def _reference(x, params, compute_dtype=jnp.float32):
    """Pure-JAX reference using the same operand dtype as the kernel."""
    w1, b1, w2, b2, w3, b3 = params
    cd = compute_dtype
    h = jnp.dot(x.astype(cd), w1.astype(cd), preferred_element_type=jnp.float32) + b1
    h = jnp.where(h > 0, h, 0.2 * h)
    h = jnp.dot(h.astype(cd), w2.astype(cd), preferred_element_type=jnp.float32) + b2
    feats = jnp.where(h > 0, h, 0.2 * h)
    logit = jnp.sum(feats * w3.reshape(1, -1), axis=-1, keepdims=True) + b3
    return jax.nn.sigmoid(logit), feats


if __name__ == "__main__":
    key = jax.random.PRNGKey(0)
    kx, kp, kx2, kx3 = jax.random.split(key, 4)

    # ---- small, module-consistent shapes (bf16 matmul path, D % 128 != 0) ----
    B, INPUT_DIM = 8, 32
    x = jax.random.normal(kx, (B, INPUT_DIM), jnp.float32)
    params = init_params(kp, INPUT_DIM)

    validity, features = discriminator_forward(x, params)
    jax.block_until_ready((validity, features))
    ref_val, ref_feat = _reference(x, params, jnp.bfloat16)
    assert validity.shape == (B, 1) and features.shape == (B, 64)
    assert jnp.allclose(validity, ref_val, atol=2e-3, rtol=2e-3)
    assert jnp.allclose(features, ref_feat, atol=2e-3, rtol=2e-3)

    # ---- pure f32 path sanity check (looser tol: Mosaic/XLA f32-matmul pass counts
    # ---- may differ; this mainly validates the f32 compile/dataflow path) ----------
    v32, f32_ = discriminator_forward(x, params, compute_dtype=jnp.float32)
    jax.block_until_ready((v32, f32_))
    rv32, rf32 = _reference(x, params, jnp.float32)
    assert jnp.allclose(v32, rv32, atol=5e-3, rtol=5e-3)
    assert jnp.allclose(f32_, rf32, atol=5e-3, rtol=5e-3)

    # ---- multi-step grid, K tail (D%128!=0), partial last batch block --------
    B2, D2 = 1000, 200
    x2 = jax.random.normal(kx2, (B2, D2), jnp.float32)
    params2 = init_params(kp, D2)
    v2, f2 = discriminator_forward(x2, params2)
    jax.block_until_ready((v2, f2))
    rv2, rf2 = _reference(x2, params2, jnp.bfloat16)
    assert v2.shape == (B2, 1) and f2.shape == (B2, 64)
    assert jnp.allclose(v2, rv2, atol=2e-3, rtol=2e-3)
    assert jnp.allclose(f2, rf2, atol=2e-3, rtol=2e-3)

    # ---- fully aligned case (D multiple of 128, B multiple of the tile) ------
    B3, D3 = 512, 256
    x3 = jax.random.normal(kx3, (B3, D3), jnp.float32)
    params3 = init_params(kp, D3)
    v3, f3 = discriminator_forward(x3, params3)
    jax.block_until_ready((v3, f3))
    rv3, rf3 = _reference(x3, params3, jnp.bfloat16)
    assert v3.shape == (B3, 1) and f3.shape == (B3, 64)
    assert jnp.allclose(v3, rv3, atol=2e-3, rtol=2e-3)
    assert jnp.allclose(f3, rf3, atol=2e-3, rtol=2e-3)

    print("KERNEL_OK")
</pallas_src>

<mosaic_0001>
module attributes {stable_mosaic.version = 11 : i64} {
  func.func @_disc_kernel(%arg0: i32, %arg1: memref<8x32xf32, #tpu.memory_space<vmem>>, %arg2: memref<128x128xbf16, #tpu.memory_space<vmem>>, %arg3: memref<128x64xbf16, #tpu.memory_space<vmem>>, %arg4: memref<8x128xf32, #tpu.memory_space<vmem>>, %arg5: memref<8x64xf32, #tpu.memory_space<vmem>>, %arg6: memref<8x1xf32, #tpu.memory_space<vmem>>, %arg7: memref<8x128xbf16, #tpu.memory_space<vmem>>) attributes {dimension_semantics = [#tpu.dimension_semantics<parallel>], iteration_bounds = array<i64: 1>, scalar_prefetch = 0 : i64, scratch_operands = 1 : i64, tpu.core_type = #tpu.core_type<tc>, window_params = [{transform_indices = @transform_0, window_bounds = array<i64: 8, 32>}, {pipeline_mode = #tpu.pipeline_mode<synchronous>, transform_indices = @transform_1, window_bounds = array<i64: 128, 128>}, {pipeline_mode = #tpu.pipeline_mode<synchronous>, transform_indices = @transform_2, window_bounds = array<i64: 128, 64>}, {pipeline_mode = #tpu.pipeline_mode<synchronous>, transform_indices = @transform_3, window_bounds = array<i64: 8, 128>}, {transform_indices = @transform_4, window_bounds = array<i64: 8, 64>}, {transform_indices = @transform_5, window_bounds = array<i64: 8, 1>}]} {
    %c0 = arith.constant 0 : index
    %c0_0 = arith.constant 0 : index
    %0 = vector.load %arg1[%c0, %c0_0] : memref<8x32xf32, #tpu.memory_space<vmem>>, vector<8x32xf32>
    %1 = arith.truncf %0 : vector<8x32xf32> to vector<8x32xbf16>
    %cst = arith.constant 0.000000e+00 : bf16
    %2 = vector.broadcast %cst : bf16 to vector<8x128xbf16>
    %c0_1 = arith.constant 0 : index
    %c0_2 = arith.constant 0 : index
    %3 = vector.load %arg7[%c0_1, %c0_2] : memref<8x128xbf16, #tpu.memory_space<vmem>>, vector<8x128xbf16>
    tpu.vector_store %arg7[%c0_1, %c0_2], %2 {strides = array<i32>} : memref<8x128xbf16, #tpu.memory_space<vmem>>, vector<8x128xbf16>,
    %c0_3 = arith.constant 0 : index
    %c0_4 = arith.constant 0 : index
    %4 = vector.load %arg7[%c0_3, %c0_4] : memref<8x128xbf16, #tpu.memory_space<vmem>>, vector<8x32xbf16>
    tpu.vector_store %arg7[%c0_3, %c0_4], %1 {strides = array<i32>} : memref<8x128xbf16, #tpu.memory_space<vmem>>, vector<8x32xbf16>,
    %c0_5 = arith.constant 0 : index
    %c0_6 = arith.constant 0 : index
    %5 = vector.load %arg7[%c0_5, %c0_6] : memref<8x128xbf16, #tpu.memory_space<vmem>>, vector<8x128xbf16>
    %c0_7 = arith.constant 0 : index
    %c0_8 = arith.constant 0 : index
    %6 = vector.load %arg2[%c0_7, %c0_8] : memref<128x128xbf16, #tpu.memory_space<vmem>>, vector<128x128xbf16>
    %c0_9 = arith.constant 0 : index
    %c0_10 = arith.constant 0 : index
    %7 = vector.load %arg3[%c0_9, %c0_10] : memref<128x64xbf16, #tpu.memory_space<vmem>>, vector<128x64xbf16>
    %c0_11 = arith.constant 0 : index
    %c0_12 = arith.constant 0 : index
    %8 = vector.load %arg4[%c0_11, %c0_12] : memref<8x128xf32, #tpu.memory_space<vmem>>, vector<1x128xf32>
    %c1 = arith.constant 1 : index
    %c0_13 = arith.constant 0 : index
    %9 = vector.load %arg4[%c1, %c0_13] : memref<8x128xf32, #tpu.memory_space<vmem>>, vector<1x64xf32>
    %c2 = arith.constant 2 : index
    %c0_14 = arith.constant 0 : index
    %10 = vector.load %arg4[%c2, %c0_14] : memref<8x128xf32, #tpu.memory_space<vmem>>, vector<1x1xf32>
    %c3 = arith.constant 3 : index
    %c0_15 = arith.constant 0 : index
    %11 = vector.load %arg4[%c3, %c0_15] : memref<8x128xf32, #tpu.memory_space<vmem>>, vector<1x64xf32>
    %cst_16 = arith.constant dense<0.000000e+00> : vector<8x128xf32>
    %12 = tpu.matmul %5, %6, %cst_16 {dimension_numbers = #tpu.dot_dimension_numbers<[1], [0], [0], [1], [0, 0, 1, 1], [], []>} : vector<8x128xbf16>, vector<128x128xbf16>, vector<8x128xf32> -> vector<8x128xf32>
    %13 = vector.broadcast %8 : vector<1x128xf32> to vector<8x128xf32>
    %14 = arith.addf %12, %13 : vector<8x128xf32>
    %cst_17 = arith.constant 0.000000e+00 : f32
    %15 = vector.broadcast %cst_17 : f32 to vector<8x128xf32>
    %16 = arith.cmpf ogt, %14, %15 : vector<8x128xf32>
    %cst_18 = arith.constant 2.000000e-01 : f32
    %17 = vector.broadcast %cst_18 : f32 to vector<8x128xf32>
    %18 = arith.mulf %17, %14 : vector<8x128xf32>
    %19 = arith.select %16, %14, %18 : vector<8x128xi1>, vector<8x128xf32>
    %20 = arith.truncf %19 : vector<8x128xf32> to vector<8x128xbf16>
    %cst_19 = arith.constant dense<0.000000e+00> : vector<8x64xf32>
    %21 = tpu.matmul %20, %7, %cst_19 {dimension_numbers = #tpu.dot_dimension_numbers<[1], [0], [0], [1], [0, 0, 1, 1], [], []>} : vector<8x128xbf16>, vector<128x64xbf16>, vector<8x64xf32> -> vector<8x64xf32>
    %22 = vector.broadcast %9 : vector<1x64xf32> to vector<8x64xf32>
    %23 = arith.addf %21, %22 : vector<8x64xf32>
    %cst_20 = arith.constant 0.000000e+00 : f32
    %24 = vector.broadcast %cst_20 : f32 to vector<8x64xf32>
    %25 = arith.cmpf ogt, %23, %24 : vector<8x64xf32>
    %cst_21 = arith.constant 2.000000e-01 : f32
    %26 = vector.broadcast %cst_21 : f32 to vector<8x64xf32>
    %27 = arith.mulf %26, %23 : vector<8x64xf32>
    %28 = arith.select %25, %23, %27 : vector<8x64xi1>, vector<8x64xf32>
    %29 = vector.broadcast %11 : vector<1x64xf32> to vector<8x64xf32>
    %30 = arith.mulf %28, %29 : vector<8x64xf32>
    %cst_22 = arith.constant dense<0.000000e+00> : vector<8xf32>
    %31 = vector.multi_reduction <add>, %30, %cst_22 [1] : vector<8x64xf32> to vector<8xf32>
    %32 = vector.shape_cast %31 : vector<8xf32> to vector<8x1xf32>
    %33 = vector.broadcast %10 : vector<1x1xf32> to vector<8x1xf32>
    %34 = arith.addf %32, %33 : vector<8x1xf32>
    %35 = arith.negf %34 : vector<8x1xf32>
    %36 = math.exp %35 : vector<8x1xf32>
    %cst_23 = arith.constant 1.000000e+00 : f32
    %37 = vector.broadcast %cst_23 : f32 to vector<8x1xf32>
    %38 = arith.addf %37, %36 : vector<8x1xf32>
    %39 = arith.divf %37, %38 : vector<8x1xf32>
    %c0_24 = arith.constant 0 : index
    %c0_25 = arith.constant 0 : index
    %40 = vector.load %arg5[%c0_24, %c0_25] : memref<8x64xf32, #tpu.memory_space<vmem>>, vector<8x64xf32>
    tpu.vector_store %arg5[%c0_24, %c0_25], %28 {strides = array<i32>} : memref<8x64xf32, #tpu.memory_space<vmem>>, vector<8x64xf32>,
    %c0_26 = arith.constant 0 : index
    %c0_27 = arith.constant 0 : index
    %41 = vector.load %arg6[%c0_26, %c0_27] : memref<8x1xf32, #tpu.memory_space<vmem>>, vector<8x1xf32>
    tpu.vector_store %arg6[%c0_26, %c0_27], %39 {strides = array<i32>} : memref<8x1xf32, #tpu.memory_space<vmem>>, vector<8x1xf32>,
    return
  }
  func.func @transform_0(%arg0: i32) -> (i32, i32) {
    %c0_i32 = arith.constant 0 : i32
    %c0_i32_0 = arith.constant 0 : i32
    return %arg0, %c0_i32 : i32, i32
  }
  func.func @transform_1(%arg0: i32) -> (i32, i32) {
    %c0_i32 = arith.constant 0 : i32
    %c0_i32_0 = arith.constant 0 : i32
    %c0_i32_1 = arith.constant 0 : i32
    return %c0_i32, %c0_i32_0 : i32, i32
  }
  func.func @transform_2(%arg0: i32) -> (i32, i32) {
    %c0_i32 = arith.constant 0 : i32
    %c0_i32_0 = arith.constant 0 : i32
    %c0_i32_1 = arith.constant 0 : i32
    return %c0_i32, %c0_i32_0 : i32, i32
  }
  func.func @transform_3(%arg0: i32) -> (i32, i32) {
    %c0_i32 = arith.constant 0 : i32
    %c0_i32_0 = arith.constant 0 : i32
    %c0_i32_1 = arith.constant 0 : i32
    return %c0_i32, %c0_i32_0 : i32, i32
  }
  func.func @transform_4(%arg0: i32) -> (i32, i32) {
    %c0_i32 = arith.constant 0 : i32
    %c0_i32_0 = arith.constant 0 : i32
    return %arg0, %c0_i32 : i32, i32
  }
  func.func @transform_5(%arg0: i32) -> (i32, i32) {
    %c0_i32 = arith.constant 0 : i32
    %c0_i32_0 = arith.constant 0 : i32
    return %arg0, %c0_i32 : i32, i32
  }
}

</mosaic_0001>

<bundles_post_ra>
// kernel: discriminator_forward.1
= control target key start
LH: loop header
LB: loop body
LE: loop exit
PB: predicated region body
PF: predicated region fallthrough
CT: control target
= control target key end

     0   :  { %v361_v1 = vmov 0   ;;  %vm24_vm0 = vcmask 257024   ;;  %s462_s0 = inlined_call_operand.vmem [shape: f32[8,32], index: 0, kind: input, shape index: {}]   ;;  %s463_s1 = inlined_call_operand.vmem [shape: bf16[128,128], index: 1, kind: input, shape index: {}]   ;;  %s464_s2 = inlined_call_operand.vmem [shape: bf16[128,64], index: 2, kind: input, shape index: {}]   ;;  %s465_s3 = inlined_call_operand.vmem [shape: f32[8,128], index: 3, kind: input, shape index: {}]   ;;  %s466_s4 = inlined_call_operand.hbm [shape: f32[8,64], index: 4, kind: output, shape index: {0}]   ;;  %s467_s5 = inlined_call_operand.vmem [shape: f32[8,1], index: 5, kind: output, shape index: {1}]  }
   0x1   :  { %v316_v0 = vld [vmem:[%s463_s1 + $0x38] sm:$0xff]  ;;  %23 = vst [vmem:[#allocation2] sm:$0xf] %v361_v1  ;;  %v315_v2 = vld [vmem:[%s463_s1 + $0x30] sm:$0xff]  ;;  %v21_v3 = vld [vmem:[%s462_s0] sm:$0xff] }
   0x2   :  { %112 = vmatpush.bf16.msra.mxu0 %v316_v0  ;;  %v22_v4 = vpack.c.bf16 %v21_v3, %v21_v3  ;;  %v324_v5 = vld [vmem:[%s464_s2 + $0x38] sm:$0xff]  ;;  %v314_v6 = vld [vmem:[%s463_s1 + $0x28] sm:$0xff]  ;;  %v323_v7 = vld [vmem:[%s464_s2 + $0x30] sm:$0xff] }
   0x3   :  { %178 = vmatpush.bf16.msra.mxu1 %v324_v5 }
   0x4   :  { %25 = vst.msk [vmem:[#allocation2] sm:$0xf] %vm24_vm0, %v22_v4 }
   0x6   :  { %113 = vmatpush.bf16.msra.mxu0 %v315_v2 }
   0x7   :  { %11 = vsyncpa [#allocation4], 0  ;;  %179 = vmatpush.bf16.msra.mxu1 %v323_v7  ;;  %v322_v8 = vld [vmem:[%s464_s2 + $0x28] sm:$0xff]  ;;  %v313_v9 = vld [vmem:[%s463_s1 + $0x20] sm:$0xff]  ;;  %vm196_vm3 = vcmask 523264   ;;  %s362_s0 = smov [#allocation3]  }
   0x8   :  { %v321_v10 = vld [vmem:[%s464_s2 + $0x20] sm:$0xff]  ;;  %v312_v11 = vld [vmem:[%s463_s1 + $0x18] sm:$0xff]  ;;  %v311_v13 = vld [vmem:[%s463_s1 + $0x10] sm:$0xff]  ;;  %s229_s30 = sshll.u32 %s362_s0, 4  ;;  %s231_s8 = sshll.u32 %s466_s4, 4  ;;  %vm222_vm7 = vcmask 7168   ;;  %s230_s30 = int_to_ptr.vmem [resolvable:$true] %s229_s30  ;;  %s232_s8 = int_to_ptr.hbm [resolvable:$true] %s231_s8 }
   0x9   :  { %v320_v12 = vld [vmem:[%s464_s2 + $0x18] sm:$0xff]  ;;  %v319_v14 = vld [vmem:[%s464_s2 + $0x10] sm:$0xff]  ;;  %v310_v15 = vld [vmem:[%s463_s1 + $0x8] sm:$0xff] }
   0xa   :  { %114 = vmatpush.bf16.msra.mxu0 %v314_v6  ;;  %v309_v16 = vld [vmem:[%s463_s1] sm:$0xff]  ;;  %v318_v18 = vld [vmem:[%s464_s2 + $0x8] sm:$0xff] }
   0xb   :  { %180 = vmatpush.bf16.msra.mxu1 %v322_v8  ;;  %v26_v17 = vld [vmem:[#allocation2] sm:$0xf] }
   0xc   :  { %v317_v19 = vld [vmem:[%s464_s2] sm:$0xff] }
   0xd   :  { %v327_v20 = vld [vmem:[%s465_s3] ss:$0 sm:$0xff]  ;;  %v328_v27 = vld [vmem:[%s465_s3 + $0x1] ss:$0 sm:$0xff]  ;;  %v329_v30 = vld [vmem:[%s465_s3 + $0x3] ss:$0 sm:$0xff] }
   0xe   :  { %115 = vmatpush.bf16.msra.mxu0 %v313_v9  ;;  %v330_v36 = vld [vmem:[%s465_s3 + $0x2] ss:$0 sm:$0xff] }
   0xf   :  { %181 = vmatpush.bf16.msra.mxu1 %v321_v10 }
  0x12   :  { %116 = vmatpush.bf16.msra.mxu0 %v312_v11 }
  0x13   :  { %182 = vmatpush.bf16.msra.mxu1 %v320_v12 }
  0x16   :  { %117 = vmatpush.bf16.msra.mxu0 %v311_v13 }
  0x17   :  { %183 = vmatpush.bf16.msra.mxu1 %v319_v14 }
  0x1a   :  { %118 = vmatpush.bf16.msra.mxu0 %v310_v15 }
  0x1b   :  { %184 = vmatpush.bf16.msra.mxu1 %v318_v18 }
  0x1e   :  { %119 = vmatpush.bf16.msra.mxu0 %v309_v16 }
  0x1f   :  { %185 = vmatpush.bf16.msra.mxu1 %v317_v19 }
  0x21   :  { %120 = vmatmul.bf16.vlgmr.msra.gmra.mxu0 %v26_v17 }
  0x9e   :  { %v121_v21 = vpop.f32.mrf.mxu0 }
  0x9f   :  { %v122_v22 = vadd.f32 %v327_v20, %v121_v21 }
  0xa1   :  { %v126_v23 = vmul.f32 0.2, %v122_v22  ;;  %vm125_vm1 = vcmp.gt.f32.partialorder %v122_v22, 0.0 }
  0xa3   :  { %v127_v24 = vsel %vm125_vm1, %v122_v22, %v126_v23 }
  0xa4   :  { %v128_v25 = vpack.c.bf16 %v127_v24, %v127_v24 }
  0xa6   :  { %v123_v26 = vpop.f32.mrf.mxu0  ;;  %186 = vmatmul.bf16.vlgmr.msra.gmra.mxu1 %v128_v25 }
 0x123   :  { %v187_v28 = vpop.f32.mrf.mxu1 }
 0x124   :  { %v188_v29 = vadd.f32 %v328_v27, %v187_v28 }
 0x126   :  { %v192_v31 = vmul.f32 0.2, %v188_v29  ;;  %vm191_vm2 = vcmp.gt.f32.partialorder %v188_v29, 0.0 }
 0x128   :  { %v193_v32 = vsel %vm191_vm2, %v188_v29, %v192_v31 }
 0x129   :  { %v195_v33 = vmul.f32 %v329_v30, %v193_v32  ;;  %221 = vst.msk [vmem:[#allocation3] sm:$0xff] %vm196_vm3, %v193_v32 }
 0x12a   :  { %234 = dma.vmem_to_hbm [thread:$0]  %s230_s30, 128, %s232_s8, [#allocation4]  }
 0x12b   :  { %v189_v34 = vpop.f32.mrf.mxu1  ;;  %v197_v35 = vsel %vm196_vm3, %v195_v33, 0.0 }
 0x12c   :  { %198 = vadd.xlane.f32.xlu0 %v197_v35 }
 0x19f   :  { %v199_v37 = vpop.xlane.xlu0 %198 }
 0x1a0   :  { %v201_v38 = vadd.f32 %v330_v36, %v199_v37 }
 0x1a2   :  { %v308_v39 = vmul.f32 -1.442695, %v201_v38 }
 0x1a4   :  { %331 = vpow2.f32 %v308_v39 }
 0x1aa   :  { %v332_v40 = vpop.eup %331 }
 0x1ab   :  { %v205_v41 = vadd.f32 1.0, %v332_v40 }
 0x1ad   :  { %333 = vrcp.f32 %v205_v41  ;;  %v217_v45 = vand.u32 2147483648, %v205_v41  ;;  %v215_v47 = vand.u32 2147483647, %v205_v41  ;;  %vm211_vm5 = vweird.f32 %v205_v41 }
 0x1af   :  { %v218_v49 = vor.u32 1.1754944e-38, %v217_v45  ;;  %vm216_vm8 = vcmp.eq.f32.partialorder %v215_v47, 8.507059e+37 }
 0x1b3   :  { %v334_v42 = vpop.eup %333 }
 0x1b4   :  { %v207_v43 = vmul.f32 %v334_v42, %v205_v41  ;;  %vm212_vm4 = vweird.f32 %v334_v42 }
 0x1b5   :  { %vm213_vm6 = vmor %vm211_vm5, %vm212_vm4 }
 0x1b6   :  { %v208_v44 = vsub.f32 1.0, %v207_v43 }
 0x1b8   :  { %v209_v46 = vmul.f32 %v334_v42, %v208_v44 }
 0x1ba   :  { %v210_v48 = vadd.f32 %v334_v42, %v209_v46 }
 0x1bc   :  { %v214_v50 = vsel %vm213_vm6, %v334_v42, %v210_v48 }
 0x1bd   :  { %v219_v51 = vsel %vm216_vm8, %v218_v49, %v214_v50 }
 0x1be   :  { %223 = vst.msk [vmem:[%s467_s5] sm:$0xff] %vm222_vm7, %v219_v51 }
 0x1bf   :  { %359 = dma.done.wait [#allocation4], 128  }
 0x1c0   :  { %360 = vsyncadd [#allocation4], 4294967168 }
 0x1c1   :  { %243 = vsyncpa [#allocation4], 1 }

</bundles_post_ra>
